<compile_context>
chip_gen: v5e
topology: v5e:2x2
jax: 0.10.0
libtpu: 0.0.40
codegen_flags: <defaults>
</compile_context>

<pallas_src>
import math
import jax
import jax.numpy as jnp
from jax.experimental import pallas as pl
from jax.experimental.pallas import tpu as pltpu

# ---------------- config (from RegionLoss.__init__ / net cfg) ----------------
NUM_CLASSES    = 16
NUM_ANCHORS    = 3
IGNORE_THRESH  = 0.5
WIDTH          = 416          # net_info['width']  (forward asserts stride==32)
HEIGHT         = 416
COORD_SCALE    = 1.0
OBJECT_SCALE   = 5.0
NOOBJECT_SCALE = 1.0
CLASS_SCALE    = 1.0

GRID   = 13                   # asserted: gride_num == 13
STRIDE = 32                   # asserted: stride == 32
MAP1   = GRID * GRID          # 169
D      = 5 + NUM_CLASSES      # 21 channels per prediction

# Fused-slab channel layout (channels = sublane axis, rows N = lane axis):
#   0..3   pred x, y, w, h
#   4      pred conf
#   5..20  pred class scores
#   21..36 tcls one-hot
#   37     conf_mask      38 coord_mask     39 cls_mask     40 tconf
#   41..44 tx, ty, tw, th (pixels)
#   45..47 zero pad (sublane-multiple alignment)
C_MAP  = D
C_TCLS = NUM_CLASSES
C_AUX  = 8
C_USED = C_MAP + C_TCLS + C_AUX      # 45
C_PAD  = 48                          # rounded up to a multiple of 8


# --------------------------- Pallas loss kernel ------------------------------
def _loss_kernel(x_ref, out_ref):
    # All slices are lane-dense (c, NP) blocks.
    pred_box   = x_ref[0:4, :]          # (4, NP)  x, y, w, h
    pred_conf  = x_ref[4:5, :]          # (1, NP)
    pred_cls   = x_ref[5:21, :]         # (16, NP)
    tcls       = x_ref[21:37, :]        # (16, NP)
    conf_mask  = x_ref[37:38, :]        # (1, NP)
    coord_mask = x_ref[38:39, :]        # (1, NP)
    cls_mask   = x_ref[39:40, :]        # (1, NP)
    tconf      = x_ref[40:41, :]        # (1, NP)
    tbox       = x_ref[41:45, :]        # (4, NP)  tx, ty, tw, th (pixels)

    inv_w = jnp.float32(1.0 / WIDTH)
    twn = tbox[2:3, :] * inv_w
    thn = tbox[3:4, :] * inv_w
    # (2 - tw*th) * coord_mask / W  — hoisted once, reused for x/y/w/h.
    w_coord = (2.0 - twn * thn) * coord_mask * inv_w        # (1, NP)

    # conf: (conf*mask - tconf*mask)^2 == mask^2 * (conf - tconf)^2
    d_conf  = conf_mask * (pred_conf - tconf)               # (1, NP)
    # cls: cls_mask is 0/1, so mask*(d^2) == selected-row MSE
    d_cls   = pred_cls - tcls                               # (16, NP)
    # coord: ((2-tw*th)*p*mask/W - (2-tw*th)*t*mask/W)^2 == (w_coord*(p-t))^2
    d_coord = w_coord * (pred_box - tbox)                   # (4, NP)

    per_lane = (d_conf * d_conf
                + CLASS_SCALE * jnp.sum(cls_mask * (d_cls * d_cls),
                                        axis=0, keepdims=True)
                + COORD_SCALE * jnp.sum(d_coord * d_coord,
                                        axis=0, keepdims=True))  # (1, NP)

    out_ref[0, 0] = 0.5 * jnp.sum(per_lane)


# ----------------------- target preprocessing (glue) -------------------------
# TODO(synk): bbox_iou is not defined in the source module; standard corner
# (x1,y1,x2,y2) IoU with non-negative intersection is used here.
def _bbox_iou(pred_boxes, tgt_box):
    ix1 = jnp.maximum(pred_boxes[:, 0], tgt_box[0])
    iy1 = jnp.maximum(pred_boxes[:, 1], tgt_box[1])
    ix2 = jnp.minimum(pred_boxes[:, 2], tgt_box[2])
    iy2 = jnp.minimum(pred_boxes[:, 3], tgt_box[3])
    inter = jnp.clip(ix2 - ix1, 0.0, None) * jnp.clip(iy2 - iy1, 0.0, None)
    a1 = (pred_boxes[:, 2] - pred_boxes[:, 0]) * (pred_boxes[:, 3] - pred_boxes[:, 1])
    a2 = (tgt_box[2] - tgt_box[0]) * (tgt_box[3] - tgt_box[1])
    return inter / (a1 + a2 - inter + 1e-16)


def _build_targets(pred, target):
    """pred: (B, MAP1, 3, D) f32;  target: (B, T, 5) f32 (x1,y1,x2,y2,cls).

    vmap over batch, lax.scan over targets — preserves the original
    sequential (last-write-wins) scatter semantics without Python unrolling.
    """
    sqrt_noobj = math.sqrt(NOOBJECT_SCALE)
    sqrt_obj   = math.sqrt(OBJECT_SCALE)

    def per_batch(pred_b, tgt_b):
        init = (
            jnp.full((MAP1, NUM_ANCHORS), sqrt_noobj, jnp.float32),   # conf_mask
            jnp.zeros((MAP1, NUM_ANCHORS), jnp.float32),              # coord_mask
            jnp.zeros((MAP1, NUM_ANCHORS), jnp.float32),              # cls_mask
            jnp.zeros((MAP1, NUM_ANCHORS), jnp.float32),              # tconf
            jnp.zeros((MAP1, NUM_ANCHORS), jnp.float32),              # tx
            jnp.zeros((MAP1, NUM_ANCHORS), jnp.float32),              # ty
            jnp.zeros((MAP1, NUM_ANCHORS), jnp.float32),              # tw
            jnp.zeros((MAP1, NUM_ANCHORS), jnp.float32),              # th
            jnp.zeros((MAP1, NUM_ANCHORS, NUM_CLASSES), jnp.float32), # tcls
        )

        def step(carry, tg):
            (conf_mask, coord_mask, cls_mask, tconf, tx, ty, tw, th, tcls) = carry
            loc_x = (tg[0] + tg[2]) * 0.5
            loc_y = (tg[1] + tg[3]) * 0.5
            # TODO(synk): original never clamps this cell index; out-of-image
            # targets would go out of bounds there (jnp scatters clip instead).
            idx = (jnp.floor(loc_y / STRIDE) * GRID
                   + jnp.floor(loc_x / STRIDE)).astype(jnp.int32)

            boxes  = pred_b[idx]                                  # (3, D)
            half_w = boxes[:, 2] * 0.5
            half_h = boxes[:, 3] * 0.5
            pred_corners = jnp.stack(
                [boxes[:, 0] - half_w, boxes[:, 1] - half_h,
                 boxes[:, 0] + half_w, boxes[:, 1] + half_h], axis=-1)  # (3, 4)
            ious = _bbox_iou(pred_corners, tg[:4])                # (3,)

            max_index = jnp.argmax(ious)
            max_iou   = jnp.max(ious)
            cls_id    = tg[4].astype(jnp.int32)

            row = jnp.where(ious > IGNORE_THRESH, 0.0, conf_mask[idx])
            conf_mask  = conf_mask.at[idx].set(row).at[idx, max_index].set(sqrt_obj)
            coord_mask = coord_mask.at[idx, max_index].set(1.0)
            cls_mask   = cls_mask.at[idx, max_index].set(1.0)
            tconf      = tconf.at[idx, max_index].set(max_iou)
            tcls       = tcls.at[idx, max_index, cls_id].set(1.0)
            tx = tx.at[idx, max_index].set(loc_x)
            ty = ty.at[idx, max_index].set(loc_y)
            tw = tw.at[idx, max_index].set(tg[2] - tg[0])
            th = th.at[idx, max_index].set(tg[3] - tg[1])
            return (conf_mask, coord_mask, cls_mask, tconf,
                    tx, ty, tw, th, tcls), None

        final, _ = jax.lax.scan(step, init, tgt_b)
        return final

    return jax.vmap(per_batch)(pred, target)


# ------------------------------- wrapper --------------------------------------
def region_loss(output, target):
    """output: (B, MAP1*(1+4+16)*3, 5+NUM_CLASSES); target: (B, T, 5).
    Reproduces the original forward, which only runs scale l=0 (early return)."""
    B = output.shape[0]
    # l = 0 slice: first 3*MAP1 predictions, viewed as (B, MAP1, 3, D)
    pred = output[:, :MAP1 * NUM_ANCHORS, :].reshape(
        B, MAP1, NUM_ANCHORS, D).astype(jnp.float32)

    (conf_mask, coord_mask, cls_mask, tconf,
     tx, ty, tw, th, tcls) = _build_targets(pred, target.astype(jnp.float32))

    N  = B * MAP1 * NUM_ANCHORS                 # e.g. 1014 for B=2
    NP = ((N + 127) // 128) * 128               # lane-pad to multiple of 128

    # Fused lane-dense slab: channels along axis 0, prediction rows along lanes.
    map_cn  = pred.reshape(N, D).T                              # (21, N)
    tcls_cn = tcls.reshape(N, NUM_CLASSES).T                    # (16, N)
    aux_cn  = jnp.stack(
        [conf_mask.reshape(N), coord_mask.reshape(N), cls_mask.reshape(N),
         tconf.reshape(N), tx.reshape(N), ty.reshape(N),
         tw.reshape(N), th.reshape(N)], axis=0)                 # (8, N)
    slab = jnp.concatenate([map_cn, tcls_cn, aux_cn], axis=0)   # (45, N)
    # Padded lanes/channels are zero; masks == 0 there, so they contribute 0.
    slab = jnp.pad(slab, ((0, C_PAD - C_USED), (0, NP - N)))    # (48, NP)

    # Single grid step: ~200 KB f32 fits VMEM on v5e/v6e/v7x with no re-tiling.
    loss = pl.pallas_call(
        _loss_kernel,
        out_shape=jax.ShapeDtypeStruct((1, 1), jnp.float32),
        grid=(1,),
        in_specs=[pl.BlockSpec((C_PAD, NP), lambda i: (0, 0))],
        out_specs=pl.BlockSpec((1, 1), lambda i: (0, 0),
                               memory_space=pltpu.MemorySpace.SMEM),
        compiler_params=pltpu.CompilerParams(
            dimension_semantics=("arbitrary",)),
    )(slab)

    return loss[0, 0]


region_loss_jit = jax.jit(region_loss)


# --------------------------------- main ---------------------------------------
if __name__ == "__main__":
    BATCH = 2
    NUM_TARGETS = 4

    key = jax.random.PRNGKey(0)
    k1, k2, k3, k4, k5 = jax.random.split(key, 5)

    # Prediction tensor: (B, MAP1*(1+4+16)*3, 5+classes) = (2, 10647, 21)
    output = jax.random.normal(
        k1, (BATCH, MAP1 * (1 + 4 + 16) * 3, D), dtype=jnp.float32)

    # Targets: (B, T, 5) = (xmin, ymin, xmax, ymax, class_id), coords in pixels.
    cx = jax.random.uniform(k2, (BATCH, NUM_TARGETS), minval=40.0, maxval=380.0)
    cy = jax.random.uniform(k3, (BATCH, NUM_TARGETS), minval=40.0, maxval=380.0)
    wh = jax.random.uniform(k4, (BATCH, NUM_TARGETS, 2), minval=10.0, maxval=60.0)
    cls_id = jax.random.randint(k5, (BATCH, NUM_TARGETS), 0, NUM_CLASSES).astype(jnp.float32)
    target = jnp.stack(
        [cx - wh[..., 0] / 2, cy - wh[..., 1] / 2,
         cx + wh[..., 0] / 2, cy + wh[..., 1] / 2, cls_id], axis=-1)

    loss = region_loss_jit(output, target)
    loss = jax.block_until_ready(loss)
    print("KERNEL_OK")
</pallas_src>

<mosaic_0001>
module attributes {stable_mosaic.version = 11 : i64} {
  func.func @_loss_kernel(%arg0: i32, %arg1: memref<48x1024xf32, #tpu.memory_space<vmem>>, %arg2: memref<1x1xf32, #tpu.memory_space<smem>>) attributes {dimension_semantics = [#tpu.dimension_semantics<arbitrary>], iteration_bounds = array<i64: 1>, scalar_prefetch = 0 : i64, scratch_operands = 0 : i64, tpu.core_type = #tpu.core_type<tc>, window_params = [{pipeline_mode = #tpu.pipeline_mode<synchronous>, transform_indices = @transform_0, window_bounds = array<i64: 48, 1024>}, {transform_indices = @transform_1, window_bounds = array<i64: 1, 1>}]} {
    %c0 = arith.constant 0 : index
    %c0_0 = arith.constant 0 : index
    %0 = vector.load %arg1[%c0, %c0_0] : memref<48x1024xf32, #tpu.memory_space<vmem>>, vector<4x1024xf32>
    %c4 = arith.constant 4 : index
    %c0_1 = arith.constant 0 : index
    %1 = vector.load %arg1[%c4, %c0_1] : memref<48x1024xf32, #tpu.memory_space<vmem>>, vector<1x1024xf32>
    %c5 = arith.constant 5 : index
    %c0_2 = arith.constant 0 : index
    %2 = vector.load %arg1[%c5, %c0_2] : memref<48x1024xf32, #tpu.memory_space<vmem>>, vector<16x1024xf32>
    %c21 = arith.constant 21 : index
    %c0_3 = arith.constant 0 : index
    %3 = vector.load %arg1[%c21, %c0_3] : memref<48x1024xf32, #tpu.memory_space<vmem>>, vector<16x1024xf32>
    %c37 = arith.constant 37 : index
    %c0_4 = arith.constant 0 : index
    %4 = vector.load %arg1[%c37, %c0_4] : memref<48x1024xf32, #tpu.memory_space<vmem>>, vector<1x1024xf32>
    %c38 = arith.constant 38 : index
    %c0_5 = arith.constant 0 : index
    %5 = vector.load %arg1[%c38, %c0_5] : memref<48x1024xf32, #tpu.memory_space<vmem>>, vector<1x1024xf32>
    %c39 = arith.constant 39 : index
    %c0_6 = arith.constant 0 : index
    %6 = vector.load %arg1[%c39, %c0_6] : memref<48x1024xf32, #tpu.memory_space<vmem>>, vector<1x1024xf32>
    %c40 = arith.constant 40 : index
    %c0_7 = arith.constant 0 : index
    %7 = vector.load %arg1[%c40, %c0_7] : memref<48x1024xf32, #tpu.memory_space<vmem>>, vector<1x1024xf32>
    %c41 = arith.constant 41 : index
    %c0_8 = arith.constant 0 : index
    %8 = vector.load %arg1[%c41, %c0_8] : memref<48x1024xf32, #tpu.memory_space<vmem>>, vector<4x1024xf32>
    %9 = vector.extract_strided_slice %8 {offsets = [2, 0], sizes = [1, 1024], strides = [1, 1]} : vector<4x1024xf32> to vector<1x1024xf32>
    %cst = arith.constant 0.00240384624 : f32
    %10 = vector.broadcast %cst : f32 to vector<1x1024xf32>
    %11 = arith.mulf %9, %10 : vector<1x1024xf32>
    %12 = vector.extract_strided_slice %8 {offsets = [3, 0], sizes = [1, 1024], strides = [1, 1]} : vector<4x1024xf32> to vector<1x1024xf32>
    %cst_9 = arith.constant 0.00240384624 : f32
    %13 = vector.broadcast %cst_9 : f32 to vector<1x1024xf32>
    %14 = arith.mulf %12, %13 : vector<1x1024xf32>
    %15 = arith.mulf %11, %14 : vector<1x1024xf32>
    %cst_10 = arith.constant 2.000000e+00 : f32
    %16 = vector.broadcast %cst_10 : f32 to vector<1x1024xf32>
    %17 = arith.subf %16, %15 : vector<1x1024xf32>
    %18 = arith.mulf %17, %5 : vector<1x1024xf32>
    %cst_11 = arith.constant 0.00240384624 : f32
    %19 = vector.broadcast %cst_11 : f32 to vector<1x1024xf32>
    %20 = arith.mulf %18, %19 : vector<1x1024xf32>
    %21 = arith.subf %1, %7 : vector<1x1024xf32>
    %22 = arith.mulf %4, %21 : vector<1x1024xf32>
    %23 = arith.subf %2, %3 : vector<16x1024xf32>
    %24 = arith.subf %0, %8 : vector<4x1024xf32>
    %25 = vector.broadcast %20 : vector<1x1024xf32> to vector<4x1024xf32>
    %26 = arith.mulf %25, %24 : vector<4x1024xf32>
    %27 = arith.mulf %22, %22 : vector<1x1024xf32>
    %28 = arith.mulf %23, %23 : vector<16x1024xf32>
    %29 = vector.broadcast %6 : vector<1x1024xf32> to vector<16x1024xf32>
    %30 = arith.mulf %29, %28 : vector<16x1024xf32>
    %cst_12 = arith.constant dense<0.000000e+00> : vector<1024xf32>
    %31 = vector.multi_reduction <add>, %30, %cst_12 [0] : vector<16x1024xf32> to vector<1024xf32>
    %32 = vector.shape_cast %31 : vector<1024xf32> to vector<1x1024xf32>
    %cst_13 = arith.constant 1.000000e+00 : f32
    %33 = vector.broadcast %cst_13 : f32 to vector<1x1024xf32>
    %34 = arith.mulf %33, %32 : vector<1x1024xf32>
    %35 = arith.addf %27, %34 : vector<1x1024xf32>
    %36 = arith.mulf %26, %26 : vector<4x1024xf32>
    %cst_14 = arith.constant dense<0.000000e+00> : vector<1024xf32>
    %37 = vector.multi_reduction <add>, %36, %cst_14 [0] : vector<4x1024xf32> to vector<1024xf32>
    %38 = vector.shape_cast %37 : vector<1024xf32> to vector<1x1024xf32>
    %cst_15 = arith.constant 1.000000e+00 : f32
    %39 = vector.broadcast %cst_15 : f32 to vector<1x1024xf32>
    %40 = arith.mulf %39, %38 : vector<1x1024xf32>
    %41 = arith.addf %35, %40 : vector<1x1024xf32>
    %42 = vector.shape_cast %41 : vector<1x1024xf32> to vector<1x1x1024xf32>
    %cst_16 = arith.constant dense<0.000000e+00> : vector<1xf32>
    %43 = vector.multi_reduction <add>, %42, %cst_16 [1, 2] : vector<1x1x1024xf32> to vector<1xf32>
    %44 = vector.shape_cast %43 : vector<1xf32> to vector<1x1x1xf32>
    %45 = vector.extract %44[0, 0, 0] : f32 from vector<1x1x1xf32>
    %cst_17 = arith.constant 5.000000e-01 : f32
    %46 = arith.mulf %cst_17, %45 : f32
    %c0_18 = arith.constant 0 : index
    %c0_19 = arith.constant 0 : index
    %47 = memref.load %arg2[%c0_18, %c0_19] : memref<1x1xf32, #tpu.memory_space<smem>>
    memref.store %46, %arg2[%c0_18, %c0_19] : memref<1x1xf32, #tpu.memory_space<smem>>
    return
  }
  func.func @transform_0(%arg0: i32) -> (i32, i32) {
    %c0_i32 = arith.constant 0 : i32
    %c0_i32_0 = arith.constant 0 : i32
    %c0_i32_1 = arith.constant 0 : i32
    return %c0_i32, %c0_i32_0 : i32, i32
  }
  func.func @transform_1(%arg0: i32) -> (i32, i32) {
    %c0_i32 = arith.constant 0 : i32
    %c0_i32_0 = arith.constant 0 : i32
    %c0_i32_1 = arith.constant 0 : i32
    return %c0_i32, %c0_i32_0 : i32, i32
  }
}

</mosaic_0001>

<bundles_post_ra>
// kernel: region_loss.1
= control target key start
LH: loop header
LB: loop body
LE: loop exit
PB: predicated region body
PF: predicated region fallthrough
CT: control target
= control target key end

     0   :  { %6 = vsyncpa [#allocation3], 0  ;;  %vm338_vm0 = vcmask 1042432   ;;  %vm466_vm1 = vcmask 1040384   ;;  %vm468_vm2 = vcmask 1042434   ;;  %vm470_vm3 = vcmask 1041408   ;;  %s1137_s0 = inlined_call_operand.vmem [shape: f32[48,1024], index: 0, kind: input, shape index: {}]   ;;  %s1138_s1 = inlined_call_operand.hbm [shape: f32[1,1], index: 1, kind: output, shape index: {}]  }
   0x1   :  { %v21_v0 = vld [vmem:[%s1137_s0] sm:$0xe0]  ;;  %v22_v1 = vld [vmem:[%s1137_s0 + $0x8] sm:$0xe0]  ;;  %v23_v2 = vld [vmem:[%s1137_s0 + $0x10] sm:$0xe0] }
   0x2   :  { %v679_v3 = vld [vmem:[%s1137_s0 + $0x4] ss:$8 sm:$0xf]  ;;  %v24_v5 = vld [vmem:[%s1137_s0 + $0x18] sm:$0xe0]  ;;  %vm472_vm4 = vcmask 1044484  }
   0x3   :  { %v684_v4 = vld [vmem:[%s1137_s0 + $0x4] ss:$8 sm:$0xf0]  ;;  %v25_v6 = vld [vmem:[%s1137_s0 + $0x20] sm:$0xe0]  ;;  %vm474_vm5 = vcmask 1046534  }
   0x4   :  { %v26_v7 = vld [vmem:[%s1137_s0 + $0x28] sm:$0xe0]  ;;  %v27_v8 = vld [vmem:[%s1137_s0 + $0x30] sm:$0xe0]  ;;  %v28_v9 = vld [vmem:[%s1137_s0 + $0x38] sm:$0xe0]  ;;  %v20_v32 = vor.u32 %v684_v4, %v679_v3 }
   0x5   :  { %v29_v10 = vld [vmem:[%s1137_s0 + $0x40] sm:$0xff]  ;;  %v30_v11 = vld [vmem:[%s1137_s0 + $0x48] sm:$0xff]  ;;  %v31_v12 = vld [vmem:[%s1137_s0 + $0x50] sm:$0xff]  ;;  %vm476_vm6 = vcmask 1045508   ;;  %vm478_vm7 = vcmask 1043456   ;;  %s619_s10 = sshll.u32 %s1138_s1, 4  ;;  %s620_s10 = int_to_ptr.hbm [resolvable:$true] %s619_s10 }
   0x6   :  { %v32_v13 = vld [vmem:[%s1137_s0 + $0x58] sm:$0xff]  ;;  %v45_v14 = vld [vmem:[%s1137_s0 + $0x80] sm:$0xe0]  ;;  %v46_v15 = vld [vmem:[%s1137_s0 + $0x88] sm:$0xe0]  ;;  %s656_s13 = smov [#allocation2]  }
   0x7   :  { %v47_v16 = vld [vmem:[%s1137_s0 + $0x90] sm:$0xe0]  ;;  %v33_v17 = vld [vmem:[%s1137_s0 + $0x60] sm:$0xff]  ;;  %v34_v18 = vld [vmem:[%s1137_s0 + $0x68] sm:$0xff]  ;;  %v176_v23 = vsub.f32 %v21_v0, %v45_v14  ;;  %v177_v24 = vsub.f32 %v22_v1, %v46_v15 }
   0x8   :  { %v35_v19 = vld [vmem:[%s1137_s0 + $0x70] sm:$0xff]  ;;  %v48_v20 = vld [vmem:[%s1137_s0 + $0x98] sm:$0xe0]  ;;  %v49_v21 = vld [vmem:[%s1137_s0 + $0xa0] sm:$0xe0]  ;;  %v178_v31 = vsub.f32 %v23_v2, %v47_v16 }
   0x9   :  { %v50_v22 = vld [vmem:[%s1137_s0 + $0xa8] sm:$0xe0]  ;;  %v36_v25 = vld [vmem:[%s1137_s0 + $0x78] sm:$0xff]  ;;  %v37_v26 = vld [vmem:[%s1137_s0 + $0x80] sm:$0x1f]  ;;  %v179_v39 = vsub.f32 %v24_v5, %v48_v20  ;;  %v180_v40 = vsub.f32 %v25_v6, %v49_v21  ;;  %v796_v51 = vmul.f32 %v176_v23, %v176_v23  ;;  %v807_v58 = vmul.f32 %v177_v24, %v177_v24 }
   0xa   :  { %v38_v27 = vld [vmem:[%s1137_s0 + $0x88] sm:$0x1f]  ;;  %v51_v28 = vld [vmem:[%s1137_s0 + $0xb0] sm:$0xe0]  ;;  %v52_v29 = vld [vmem:[%s1137_s0 + $0xb8] sm:$0xe0]  ;;  %v181_v41 = vsub.f32 %v26_v7, %v50_v22  ;;  %v818_v1 = vmul.f32 %v178_v31, %v178_v31 }
   0xb   :  { %v53_v30 = vld [vmem:[%s1137_s0 + $0xc0] sm:$0xff]  ;;  %v39_v33 = vld [vmem:[%s1137_s0 + $0x90] sm:$0x1f]  ;;  %v40_v34 = vld [vmem:[%s1137_s0 + $0x98] sm:$0x1f]  ;;  %v182_v48 = vsub.f32 %v27_v8, %v51_v28  ;;  %v183_v49 = vsub.f32 %v28_v9, %v52_v29  ;;  %v841_v16 = vmul.f32 %v180_v40, %v180_v40 }
   0xc   :  { %v41_v35 = vld [vmem:[%s1137_s0 + $0xa0] sm:$0x1f]  ;;  %v54_v36 = vld [vmem:[%s1137_s0 + $0xc8] sm:$0xff]  ;;  %v55_v37 = vld [vmem:[%s1137_s0 + $0xd0] sm:$0xff]  ;;  %v184_v50 = vsub.f32 %v29_v10, %v53_v30  ;;  %v829_v10 = vmul.f32 %v179_v39, %v179_v39  ;;  %v853_v22 = vmul.f32 %v181_v41, %v181_v41 }
   0xd   :  { %v56_v38 = vld [vmem:[%s1137_s0 + $0xd8] sm:$0xff]  ;;  %v42_v42 = vld [vmem:[%s1137_s0 + $0xa8] sm:$0x1f]  ;;  %v43_v43 = vld [vmem:[%s1137_s0 + $0xb0] sm:$0x1f]  ;;  %v185_v55 = vsub.f32 %v30_v11, %v54_v36  ;;  %v186_v56 = vsub.f32 %v31_v12, %v55_v37 }
   0xe   :  { %v44_v44 = vld [vmem:[%s1137_s0 + $0xb8] sm:$0x1f]  ;;  %v57_v45 = vld [vmem:[%s1137_s0 + $0xe0] sm:$0xff]  ;;  %v58_v46 = vld [vmem:[%s1137_s0 + $0xe8] sm:$0xff]  ;;  %v187_v57 = vsub.f32 %v32_v13, %v56_v38  ;;  %v867_v28 = vmul.f32 %v184_v50, %v184_v50 }
   0xf   :  { %v59_v47 = vld [vmem:[%s1137_s0 + $0xf0] sm:$0xff]  ;;  %v60_v52 = vld [vmem:[%s1137_s0 + $0xf8] sm:$0xff]  ;;  %v61_v53 = vld [vmem:[%s1137_s0 + $0x100] sm:$0x1f]  ;;  %v188_v62 = vsub.f32 %v33_v17, %v57_v45  ;;  %v189_v63 = vsub.f32 %v34_v18, %v58_v46 }
  0x10   :  { %v62_v54 = vld [vmem:[%s1137_s0 + $0x108] sm:$0x1f]  ;;  %v63_v59 = vld [vmem:[%s1137_s0 + $0x110] sm:$0x1f]  ;;  %v64_v60 = vld [vmem:[%s1137_s0 + $0x118] sm:$0x1f]  ;;  %v190_v0 = vsub.f32 %v35_v19, %v59_v47  ;;  %v191_v7 = vsub.f32 %v36_v25, %v60_v52  ;;  %v192_v8 = vsub.f32 %v37_v26, %v61_v53  ;;  %v863_v26 = vmul.f32 %v182_v48, %v182_v48 }
  0x11   :  { %v65_v61 = vld [vmem:[%s1137_s0 + $0x120] sm:$0x1f]  ;;  %v66_v2 = vld [vmem:[%s1137_s0 + $0x128] sm:$0x1f]  ;;  %v67_v5 = vld [vmem:[%s1137_s0 + $0x130] sm:$0x1f]  ;;  %v193_v9 = vsub.f32 %v38_v27, %v62_v54  ;;  %v194_v13 = vsub.f32 %v39_v33, %v63_v59  ;;  %v195_v14 = vsub.f32 %v40_v34, %v64_v60  ;;  %v865_v27 = vmul.f32 %v183_v49, %v183_v49 }
  0x12   :  { %v68_v6 = vld [vmem:[%s1137_s0 + $0x138] sm:$0x1f]  ;;  %v834_v11 = vld [vmem:[%s1137_s0 + $0x105] ss:$8 sm:$0xf]  ;;  %v196_v15 = vsub.f32 %v41_v35, %v65_v61  ;;  %v197_v19 = vsub.f32 %v42_v42, %v66_v2  ;;  %v849_v20 = vsub.f32 %v43_v43, %v67_v5  ;;  %v877_v33 = vmul.f32 %v185_v55, %v185_v55 }
  0x13   :  { %1141 = vst [vmem:[#allocation5_spill] sm:$0xff] %v834_v11  ;;  %v839_v12 = vld [vmem:[%s1137_s0 + $0x105] ss:$8 sm:$0xf0]  ;;  %v851_v21 = vsub.f32 %v44_v44, %v68_v6  ;;  %v879_v34 = vmul.f32 %v186_v56, %v186_v56  ;;  %v881_v35 = vmul.f32 %v187_v57, %v187_v57  ;;  %v888_v38 = vld [vmem:[%s1137_s0 + $0x140] sm:$0x1e]  ;;  %v900_v41 = vmul.f32 %v188_v62, %v188_v62 }
  0x14   :  { %1142 = vst [vmem:[#allocation6_spill] sm:$0xff] %v839_v12  ;;  %v633_v17 = vld [vmem:[%s1137_s0 + $0x106] ss:$8 sm:$0xf]  ;;  %v893_v39 = vld [vmem:[%s1137_s0 + $0x148] sm:$0x1e]  ;;  %v902_v42 = vmul.f32 %v189_v63, %v189_v63  ;;  %v919_v46 = vmul.f32 %v190_v0, %v190_v0  ;;  %v921_v47 = vmul.f32 %v191_v7, %v191_v7  ;;  %v923_v48 = vmul.f32 %v192_v8, %v192_v8 }
  0x15   :  { %v634_v18 = vld [vmem:[%s1137_s0 + $0x106] ss:$8 sm:$0xf0]  ;;  %v635_v24 = vld [vmem:[%s1137_s0 + $0x107] ss:$8 sm:$0xf]  ;;  %v925_v49 = vmul.f32 %v193_v9, %v193_v9  ;;  %v938_v54 = vmul.f32 %v194_v13, %v194_v13  ;;  %v940_v55 = vmul.f32 %v195_v14, %v195_v14  ;;  %v942_v56 = vmul.f32 %v196_v15, %v196_v15 }
  0x16   :  { %v636_v25 = vld [vmem:[%s1137_s0 + $0x107] ss:$8 sm:$0xf0]  ;;  %v869_v29 = vor.u32 %v634_v18, %v633_v17  ;;  %v637_v30 = vld [vmem:[%s1137_s0 + $0x140] ss:$8 sm:$0xf]  ;;  %v947_v61 = vmul.f32 %v197_v19, %v197_v19 }
  0x17   :  { %v638_v31 = vld [vmem:[%s1137_s0 + $0x140] ss:$8 sm:$0xf0]  ;;  %v883_v36 = vor.u32 %v636_v25, %v635_v24  ;;  %v898_v40 = vld [vmem:[%s1137_s0 + $0x150] sm:$0x1e]  ;;  %1143 = vst [vmem:[#allocation7_spill] sm:$0xff] %v938_v54 }
  0x18   :  { %v84_v37 = vor.u32 %v638_v31, %v637_v30  ;;  %v907_v43 = vld [vmem:[%s1137_s0 + $0x158] sm:$0x1e]  ;;  %v912_v44 = vld [vmem:[%s1137_s0 + $0x160] sm:$0x1e]  ;;  %v917_v45 = vld [vmem:[%s1137_s0 + $0x168] sm:$0x1e] }
  0x19   :  { %v930_v50 = vld [vmem:[%s1137_s0 + $0x170] sm:$0x1e]  ;;  %v935_v52 = vld [vmem:[%s1137_s0 + $0x178] sm:$0x1e]  ;;  %v93_v53 = vmul.f32 0.0024038462, %v888_v38 }
  0x1a   :  { %1144 = vst [vmem:[#allocation8_spill] sm:$0xff] %v940_v55  ;;  %v94_v57 = vmul.f32 0.0024038462, %v893_v39  ;;  %v95_v59 = vmul.f32 0.0024038462, %v898_v40  ;;  %v955_v2 = vsub.f32 %v20_v32, %v84_v37  ;;  %v142_v55 = vperm.slane %v869_v29, 0 }
  0x1b   :  { %1145 = vst [vmem:[#allocation9_spill] sm:$0xff] %v942_v56  ;;  %v96_v60 = vmul.f32 0.0024038462, %v907_v43  ;;  %v97_v62 = vmul.f32 0.0024038462, %v912_v44  ;;  %v109_v6 = vrot.slane %v93_v53, 1 }
  0x1c   :  { %1146 = vst [vmem:[#allocation10_spill] sm:$0xff] %v947_v61  ;;  %v98_v63 = vmul.f32 0.0024038462, %v917_v45  ;;  %v99_v0 = vmul.f32 0.0024038462, %v930_v50  ;;  %v110_v7 = vrot.slane %v94_v57, 1 }
  0x1d   :  { %1147 = vst [vmem:[#allocation11_spill] sm:$0xff] %v955_v2  ;;  %v100_v5 = vmul.f32 0.0024038462, %v935_v52  ;;  %v111_v8 = vrot.slane %v95_v59, 1  ;;  %v112_v9 = vrot.slane %v96_v60, 1  ;;  %v113_v13 = vrot.slane %v97_v62, 1 }
  0x1e   :  { %v114_v14 = vrot.slane %v98_v63, 1  ;;  %v115_v15 = vrot.slane %v99_v0, 1  ;;  %v125_v18 = vmul.f32 %v109_v6, %v93_v53  ;;  %v126_v19 = vmul.f32 %v110_v7, %v94_v57  ;;  %v9_v6 = vld [vmem:[%s1137_s0] sm:$0xf] }
  0x1f   :  { %v116_v17 = vrot.slane %v100_v5, 1  ;;  %v127_v24 = vmul.f32 %v111_v8, %v95_v59  ;;  %v128_v25 = vmul.f32 %v112_v9, %v96_v60  ;;  %v129_v30 = vmul.f32 %v113_v13, %v97_v62 }
  0x20   :  { %v130_v31 = vmul.f32 %v114_v14, %v98_v63  ;;  %v131_v23 = vmul.f32 %v115_v15, %v99_v0  ;;  %v133_v4 = vsub.f32 2.0, %v125_v18  ;;  %v134_v32 = vsub.f32 2.0, %v126_v19  ;;  %v10_v14 = vld [vmem:[%s1137_s0 + $0x8] sm:$0xf]  ;;  %v11_v15 = vld [vmem:[%s1137_s0 + $0x10] sm:$0xf] }
  0x21   :  { %v132_v3 = vmul.f32 %v116_v17, %v100_v5  ;;  %v135_v37 = vsub.f32 2.0, %v127_v24  ;;  %v136_v2 = vsub.f32 2.0, %v128_v25  ;;  %v137_v11 = vsub.f32 2.0, %v129_v30 }
  0x22   :  { %v138_v12 = vsub.f32 2.0, %v130_v31  ;;  %v139_v61 = vsub.f32 2.0, %v131_v23  ;;  %v143_v54 = vperm.slane %v869_v29, 1  ;;  %v144_v53 = vperm.slane %v869_v29, 2 }
  0x23   :  { %v140_v56 = vsub.f32 2.0, %v132_v3  ;;  %v145_v57 = vperm.slane %v869_v29, 3  ;;  %v146_v59 = vperm.slane %v869_v29, 4  ;;  %v147_v60 = vperm.slane %v869_v29, 5 }
  0x24   :  { %v148_v62 = vperm.slane %v869_v29, 6  ;;  %v149_v63 = vperm.slane %v869_v29, 7  ;;  %v158_v0 = vmul.f32 %v142_v55, %v133_v4  ;;  %v159_v5 = vmul.f32 %v143_v54, %v134_v32  ;;  %v12_v29 = vld [vmem:[%s1137_s0 + $0x18] sm:$0xf]  ;;  %v13_v54 = vld [vmem:[%s1137_s0 + $0x20] sm:$0xf] }
  0x25   :  { %v160_v23 = vmul.f32 %v144_v53, %v135_v37  ;;  %v161_v7 = vmul.f32 %v145_v57, %v136_v2  ;;  %v162_v8 = vmul.f32 %v146_v59, %v137_v11  ;;  %v163_v9 = vmul.f32 %v147_v60, %v138_v12  ;;  %v14_v2 = vld [vmem:[%s1137_s0 + $0x28] sm:$0xf] }
  0x26   :  { %v164_v13 = vmul.f32 %v148_v62, %v139_v61  ;;  %v165_v55 = vmul.f32 %v149_v63, %v140_v56  ;;  %v166_v11 = vmul.f32 0.0024038462, %v158_v0  ;;  %v167_v12 = vmul.f32 0.0024038462, %v159_v5 }
  0x27   :  { %v983_v61 = vmul.f32 %v849_v20, %v849_v20  ;;  %v168_v17 = vmul.f32 0.0024038462, %v160_v23  ;;  %v169_v18 = vmul.f32 0.0024038462, %v161_v7  ;;  %v170_v19 = vmul.f32 0.0024038462, %v162_v8 }
  0x28   :  { %v990_v24 = vmul.f32 %v851_v21, %v851_v21  ;;  %v171_v25 = vmul.f32 0.0024038462, %v163_v9  ;;  %v172_v30 = vmul.f32 0.0024038462, %v164_v13  ;;  %v208_v56 = vrot.slane %v888_v38, 1 }
  0x29   :  { %v209_v31 = vrot.slane %v893_v39, 1  ;;  %v15_v20 = vld [vmem:[%s1137_s0 + $0x30] sm:$0xf]  ;;  %v210_v3 = vrot.slane %v898_v40, 1  ;;  %v211_v4 = vrot.slane %v907_v43, 1  ;;  %v212_v32 = vrot.slane %v912_v44, 1 }
  0x2a   :  { %v213_v37 = vrot.slane %v917_v45, 1  ;;  %v1001_v21 = vmul.f32 0.0024038462, %v165_v55  ;;  %v214_v53 = vrot.slane %v930_v50, 1  ;;  %v215_v38 = vrot.slane %v935_v52, 1 }
  0x2b   :  { %v224_v57 = vsub.f32 %v9_v6, %v208_v56  ;;  %v16_v39 = vld [vmem:[%s1137_s0 + $0x38] sm:$0xf]  ;;  %v225_v59 = vsub.f32 %v10_v14, %v209_v31  ;;  %v226_v60 = vsub.f32 %v11_v15, %v210_v3  ;;  %v227_v40 = vsub.f32 %v12_v29, %v211_v4 }
  0x2c   :  { %v228_v62 = vsub.f32 %v13_v54, %v212_v32  ;;  %v229_v43 = vsub.f32 %v14_v2, %v213_v37  ;;  %v230_v63 = vsub.f32 %v15_v20, %v214_v53  ;;  %v232_v44 = vperm.slane %v166_v11, 3 }
  0x2d   :  { %v233_v0 = vperm.slane %v167_v12, 3  ;;  %v234_v45 = vperm.slane %v168_v17, 3  ;;  %v235_v5 = vperm.slane %v169_v18, 3  ;;  %v236_v23 = vperm.slane %v170_v19, 3 }
  0x2e   :  { %v237_v7 = vperm.slane %v171_v25, 3  ;;  %v1008_v50 = vsub.f32 %v16_v39, %v215_v38  ;;  %v238_v52 = vperm.slane %v172_v30, 3  ;;  %v239_v6 = vperm.slane %v1001_v21, 3  ;;  %v1148_v38 = vld [vmem:[#allocation7_spill] sm:$0xff]  ;;  %v1150_v39 = vld [vmem:[#allocation9_spill] sm:$0xff] }
  0x2f   :  { %v1011_v8 = vmul.f32 %v232_v44, %v224_v57  ;;  %v1013_v9 = vmul.f32 %v233_v0, %v225_v59  ;;  %v1015_v13 = vmul.f32 %v234_v45, %v226_v60  ;;  %v1017_v14 = vmul.f32 %v235_v5, %v227_v40  ;;  %v1149_v57 = vld [vmem:[#allocation8_spill] sm:$0xff]  ;;  %v1151_v59 = vld [vmem:[#allocation10_spill] sm:$0xff] }
  0x30   :  { %v1019_v15 = vmul.f32 %v236_v23, %v228_v62  ;;  %v1021_v29 = vmul.f32 %v237_v7, %v229_v43  ;;  %v1023_v54 = vmul.f32 %v238_v52, %v230_v63  ;;  %v274_v55 = vperm.slane %v883_v36, 0 }
  0x31   :  { %v275_v11 = vperm.slane %v883_v36, 1  ;;  %v276_v12 = vperm.slane %v883_v36, 2  ;;  %v277_v2 = vperm.slane %v883_v36, 3  ;;  %v278_v17 = vperm.slane %v883_v36, 4 }
  0x32   :  { %v279_v18 = vperm.slane %v883_v36, 5  ;;  %v280_v19 = vperm.slane %v883_v36, 6  ;;  %v281_v25 = vperm.slane %v883_v36, 7  ;;  %v290_v30 = vmul.f32 %v274_v55, %v796_v51 }
  0x33   :  { %v291_v56 = vmul.f32 %v275_v11, %v807_v58  ;;  %v292_v31 = vmul.f32 %v276_v12, %v818_v1  ;;  %v293_v20 = vmul.f32 %v277_v2, %v829_v10  ;;  %v294_v3 = vmul.f32 %v278_v17, %v841_v16 }
  0x34   :  { %v295_v4 = vmul.f32 %v279_v18, %v853_v22  ;;  %v296_v32 = vmul.f32 %v280_v19, %v863_v26  ;;  %v297_v37 = vmul.f32 %v281_v25, %v865_v27  ;;  %v298_v53 = vmul.f32 %v274_v55, %v867_v28 }
  0x35   :  { %v299_v36 = vmul.f32 %v275_v11, %v877_v33  ;;  %v300_v51 = vmul.f32 %v276_v12, %v879_v34  ;;  %v301_v58 = vmul.f32 %v277_v2, %v881_v35  ;;  %v302_v1 = vmul.f32 %v278_v17, %v900_v41 }
  0x36   :  { %v303_v10 = vmul.f32 %v279_v18, %v902_v42  ;;  %v304_v16 = vmul.f32 %v280_v19, %v919_v46  ;;  %v305_v22 = vmul.f32 %v281_v25, %v921_v47  ;;  %v306_v26 = vmul.f32 %v274_v55, %v923_v48 }
  0x37   :  { %v307_v27 = vmul.f32 %v275_v11, %v925_v49  ;;  %v308_v28 = vmul.f32 %v276_v12, %v1148_v38  ;;  %v309_v33 = vmul.f32 %v277_v2, %v1149_v57  ;;  %v310_v34 = vmul.f32 %v278_v17, %v1150_v39 }
  0x38   :  { %v311_v35 = vmul.f32 %v279_v18, %v1151_v59  ;;  %v312_v41 = vmul.f32 %v280_v19, %v983_v61  ;;  %v313_v42 = vmul.f32 %v281_v25, %v990_v24  ;;  %v339_v46 = vrot.slane %v290_v30, 5 }
  0x39   :  { %v340_v60 = vrot.slane %v298_v53, 5  ;;  %v342_v47 = vrot.slane %v291_v56, 5  ;;  %v343_v40 = vrot.slane %v299_v36, 5  ;;  %v345_v48 = vrot.slane %v292_v31, 5 }
  0x3a   :  { %v346_v62 = vrot.slane %v300_v51, 5  ;;  %v348_v49 = vrot.slane %v293_v20, 5  ;;  %v349_v43 = vrot.slane %v301_v58, 5  ;;  %v351_v63 = vrot.slane %v294_v3, 5 }
  0x3b   :  { %v341_v44 = vsel %vm338_vm0, %v339_v46, %v340_v60  ;;  %v344_v0 = vsel %vm338_vm0, %v342_v47, %v343_v40  ;;  %v352_v45 = vrot.slane %v302_v1, 5  ;;  %v354_v5 = vrot.slane %v295_v4, 5 }
  0x3c   :  { %v347_v61 = vsel %vm338_vm0, %v345_v48, %v346_v62  ;;  %v350_v24 = vsel %vm338_vm0, %v348_v49, %v349_v43  ;;  %v355_v23 = vrot.slane %v303_v10, 5  ;;  %v357_v7 = vrot.slane %v296_v32, 5 }
  0x3d   :  { %v353_v52 = vsel %vm338_vm0, %v351_v63, %v352_v45  ;;  %v358_v55 = vrot.slane %v304_v16, 5  ;;  %v360_v11 = vrot.slane %v297_v37, 5  ;;  %v361_v12 = vrot.slane %v305_v22, 5 }
  0x3e   :  { %v356_v2 = vsel %vm338_vm0, %v354_v5, %v355_v23  ;;  %v363_v17 = vrot.slane %v306_v26, 5  ;;  %v365_v18 = vrot.slane %v307_v27, 5  ;;  %v367_v19 = vrot.slane %v308_v28, 5 }
  0x3f   :  { %v359_v25 = vsel %vm338_vm0, %v357_v7, %v358_v55  ;;  %v362_v30 = vsel %vm338_vm0, %v360_v11, %v361_v12  ;;  %v369_v56 = vrot.slane %v309_v33, 5  ;;  %v371_v31 = vrot.slane %v310_v34, 5 }
  0x40   :  { %v364_v20 = vsel %vm338_vm0, %v340_v60, %v363_v17  ;;  %v366_v3 = vsel %vm338_vm0, %v343_v40, %v365_v18  ;;  %v368_v4 = vsel %vm338_vm0, %v346_v62, %v367_v19  ;;  %v373_v32 = vrot.slane %v311_v35, 5 }
  0x41   :  { %v370_v37 = vsel %vm338_vm0, %v349_v43, %v369_v56  ;;  %v372_v53 = vsel %vm338_vm0, %v352_v45, %v371_v31  ;;  %v375_v36 = vrot.slane %v312_v41, 5  ;;  %v377_v51 = vrot.slane %v313_v42, 5 }
  0x42   :  { %v374_v58 = vsel %vm338_vm0, %v355_v23, %v373_v32  ;;  %v395_v1 = vadd.f32 %v364_v20, %v341_v44  ;;  %v402_v10 = vadd.f32 %v366_v3, %v344_v0  ;;  %v409_v16 = vadd.f32 %v368_v4, %v347_v61 }
  0x43   :  { %v376_v22 = vsel %vm338_vm0, %v358_v55, %v375_v36  ;;  %v378_v26 = vsel %vm338_vm0, %v361_v12, %v377_v51  ;;  %v416_v27 = vadd.f32 %v370_v37, %v350_v24  ;;  %v423_v38 = vadd.f32 %v372_v53, %v353_v52 }
  0x44   :  { %v396_v28 = vrot.slane %v395_v1, 4  ;;  %v403_v57 = vrot.slane %v402_v10, 4  ;;  %v410_v33 = vrot.slane %v409_v16, 4  ;;  %v430_v39 = vadd.f32 %v374_v58, %v356_v2 }
  0x45   :  { %v417_v34 = vrot.slane %v416_v27, 4  ;;  %v424_v59 = vrot.slane %v423_v38, 4  ;;  %v437_v35 = vadd.f32 %v376_v22, %v359_v25  ;;  %v444_v41 = vadd.f32 %v378_v26, %v362_v30 }
  0x46   :  { %v397_v42 = vadd.f32 %v396_v28, %v395_v1  ;;  %v404_v46 = vadd.f32 %v403_v57, %v402_v10  ;;  %v411_v60 = vadd.f32 %v410_v33, %v409_v16  ;;  %v431_v47 = vrot.slane %v430_v39, 4 }
  0x47   :  { %v418_v40 = vadd.f32 %v417_v34, %v416_v27  ;;  %v425_v48 = vadd.f32 %v424_v59, %v423_v38  ;;  %v438_v62 = vrot.slane %v437_v35, 4  ;;  %v445_v49 = vrot.slane %v444_v41, 4 }
  0x48   :  { %v398_v43 = vrot.slane %v397_v42, 2  ;;  %v405_v63 = vrot.slane %v404_v46, 2  ;;  %v412_v44 = vrot.slane %v411_v60, 2  ;;  %v432_v0 = vadd.f32 %v431_v47, %v430_v39  ;;  %v1155_v47 = vld [vmem:[#allocation11_spill] sm:$0xff] }
  0x49   :  { %v419_v45 = vrot.slane %v418_v40, 2  ;;  %v426_v5 = vrot.slane %v425_v48, 2  ;;  %v439_v61 = vadd.f32 %v438_v62, %v437_v35  ;;  %v446_v24 = vadd.f32 %v445_v49, %v444_v41 }
  0x4a   :  { %v399_v23 = vadd.f32 %v398_v43, %v397_v42  ;;  %v406_v7 = vadd.f32 %v405_v63, %v404_v46  ;;  %v413_v52 = vadd.f32 %v412_v44, %v411_v60  ;;  %v433_v55 = vrot.slane %v432_v0, 2  ;;  %v1153_v46 = vld [vmem:[#allocation5_spill] sm:$0xff] }
  0x4b   :  { %v420_v11 = vadd.f32 %v419_v45, %v418_v40  ;;  %v427_v12 = vadd.f32 %v426_v5, %v425_v48  ;;  %v440_v2 = vrot.slane %v439_v61, 2  ;;  %v447_v17 = vrot.slane %v446_v24, 2 }
  0x4c   :  { %v400_v18 = vrot.slane %v399_v23, 1  ;;  %v407_v19 = vrot.slane %v406_v7, 1  ;;  %v414_v25 = vrot.slane %v413_v52, 1  ;;  %v434_v30 = vadd.f32 %v433_v55, %v432_v0 }
  0x4d   :  { %v421_v56 = vrot.slane %v420_v11, 1  ;;  %v428_v31 = vrot.slane %v427_v12, 1  ;;  %v441_v20 = vadd.f32 %v440_v2, %v439_v61  ;;  %v448_v3 = vadd.f32 %v447_v17, %v446_v24 }
  0x4e   :  { %v401_v4 = vadd.f32 %v400_v18, %v399_v23  ;;  %v408_v32 = vadd.f32 %v407_v19, %v406_v7  ;;  %v415_v37 = vadd.f32 %v414_v25, %v413_v52  ;;  %v435_v53 = vrot.slane %v434_v30, 1 }
  0x4f   :  { %v422_v36 = vadd.f32 %v421_v56, %v420_v11  ;;  %v429_v51 = vadd.f32 %v428_v31, %v427_v12  ;;  %v442_v58 = vrot.slane %v441_v20, 1  ;;  %v449_v1 = vrot.slane %v448_v3, 1 }
  0x50   :  { %v436_v10 = vadd.f32 %v435_v53, %v434_v30  ;;  %v459_v16 = vrot.slane %v408_v32, 7  ;;  %v460_v22 = vrot.slane %v415_v37, 6  ;;  %v247_v57 = vmul.f32 %v239_v6, %v1008_v50  ;;  %v1152_v6 = vld [vmem:[#allocation6_spill] sm:$0xff] }
  0x51   :  { %v443_v26 = vadd.f32 %v442_v58, %v441_v20  ;;  %v450_v27 = vadd.f32 %v449_v1, %v448_v3  ;;  %v461_v38 = vrot.slane %v422_v36, 5  ;;  %v462_v28 = vrot.slane %v429_v51, 4 }
  0x52   :  { %v463_v33 = vrot.slane %v436_v10, 3  ;;  %v467_v39 = vsel %vm466_vm1, %v401_v4, %v459_v16  ;;  %v482_v21 = vmul.f32 %v1011_v8, %v1011_v8  ;;  %v483_v50 = vmul.f32 %v1013_v9, %v1013_v9 }
  0x53   :  { %v464_v34 = vrot.slane %v443_v26, 2  ;;  %v465_v59 = vrot.slane %v450_v27, 1  ;;  %v469_v35 = vsel %vm468_vm2, %v460_v22, %v461_v38  ;;  %v1154_v60 = vor.u32 %v1152_v6, %v1153_v46 }
  0x54   :  { %v473_v41 = vsel %vm472_vm4, %v462_v28, %v463_v33  ;;  %v484_v48 = vmul.f32 %v1015_v13, %v1015_v13  ;;  %v485_v62 = vmul.f32 %v1017_v14, %v1017_v14  ;;  %v486_v49 = vmul.f32 %v1019_v15, %v1019_v15 }
  0x55   :  { %v475_v42 = vsel %vm474_vm5, %v464_v34, %v465_v59  ;;  %v1088_v40 = vmul.f32 %v1155_v47, %v1154_v60  ;;  %v1097_v8 = vsel %vm470_vm3, %v467_v39, %v469_v35  ;;  %v487_v43 = vmul.f32 %v1021_v29, %v1021_v29 }
  0x56   :  { %v1100_v9 = vsel %vm476_vm6, %v473_v41, %v475_v42  ;;  %v488_v63 = vmul.f32 %v1023_v54, %v1023_v54  ;;  %v489_v44 = vmul.f32 %v247_v57, %v247_v57  ;;  %v490_v13 = vsel %vm478_vm7, %v482_v21, 0.0 }
  0x57   :  { %v497_v14 = vsel %vm478_vm7, %v483_v50, 0.0  ;;  %v504_v0 = vsel %vm478_vm7, %v484_v48, 0.0  ;;  %v491_v15 = vrot.slane %v490_v13, 4  ;;  %v511_v61 = vsel %vm478_vm7, %v485_v62, 0.0 }
  0x58   :  { %v498_v45 = vrot.slane %v497_v14, 4  ;;  %v505_v5 = vrot.slane %v504_v0, 4  ;;  %v512_v24 = vrot.slane %v511_v61, 4  ;;  %v518_v23 = vsel %vm478_vm7, %v486_v49, 0.0 }
  0x59   :  { %v525_v29 = vsel %vm478_vm7, %v487_v43, 0.0  ;;  %v532_v7 = vsel %vm478_vm7, %v488_v63, 0.0  ;;  %v492_v54 = vadd.f32 %v491_v15, %v490_v13  ;;  %v519_v11 = vrot.slane %v518_v23, 4 }
  0x5a   :  { %v499_v52 = vadd.f32 %v498_v45, %v497_v14  ;;  %v506_v55 = vadd.f32 %v505_v5, %v504_v0  ;;  %v513_v12 = vadd.f32 %v512_v24, %v511_v61  ;;  %v526_v2 = vrot.slane %v525_v29, 4 }
  0x5b   :  { %v533_v17 = vrot.slane %v532_v7, 4  ;;  %v539_v18 = vsel %vm478_vm7, %v489_v44, 0.0  ;;  %v493_v19 = vrot.slane %v492_v54, 2  ;;  %v520_v56 = vadd.f32 %v519_v11, %v518_v23 }
  0x5c   :  { %v500_v25 = vrot.slane %v499_v52, 2  ;;  %v507_v30 = vrot.slane %v506_v55, 2  ;;  %v514_v31 = vrot.slane %v513_v12, 2  ;;  %v527_v20 = vadd.f32 %v526_v2, %v525_v29 }
  0x5d   :  { %v534_v3 = vadd.f32 %v533_v17, %v532_v7  ;;  %v540_v4 = vrot.slane %v539_v18, 4  ;;  %v494_v32 = vadd.f32 %v493_v19, %v492_v54  ;;  %v521_v36 = vrot.slane %v520_v56, 2 }
  0x5e   :  { %v501_v37 = vadd.f32 %v500_v25, %v499_v52  ;;  %v508_v53 = vadd.f32 %v507_v30, %v506_v55  ;;  %v515_v51 = vadd.f32 %v514_v31, %v513_v12  ;;  %v528_v58 = vrot.slane %v527_v20, 2 }
  0x5f   :  { %v535_v1 = vrot.slane %v534_v3, 2  ;;  %v541_v10 = vadd.f32 %v540_v4, %v539_v18  ;;  %v495_v16 = vrot.slane %v494_v32, 1  ;;  %v522_v27 = vadd.f32 %v521_v36, %v520_v56 }
  0x60   :  { %v502_v22 = vrot.slane %v501_v37, 1  ;;  %v509_v26 = vrot.slane %v508_v53, 1  ;;  %v516_v38 = vrot.slane %v515_v51, 1  ;;  %v529_v28 = vadd.f32 %v528_v58, %v527_v20 }
  0x61   :  { %v536_v57 = vadd.f32 %v535_v1, %v534_v3  ;;  %v542_v33 = vrot.slane %v541_v10, 2  ;;  %v496_v39 = vadd.f32 %v495_v16, %v494_v32  ;;  %v523_v35 = vrot.slane %v522_v27, 1 }
  0x62   :  { %v503_v34 = vadd.f32 %v502_v22, %v501_v37  ;;  %v510_v59 = vadd.f32 %v509_v26, %v508_v53  ;;  %v517_v41 = vadd.f32 %v516_v38, %v515_v51  ;;  %v530_v42 = vrot.slane %v529_v28, 1 }
  0x63   :  { %v537_v21 = vrot.slane %v536_v57, 1  ;;  %v543_v50 = vadd.f32 %v542_v33, %v541_v10  ;;  %v524_v6 = vadd.f32 %v523_v35, %v522_v27  ;;  %v248_v43 = vmul.f32 %v1088_v40, %v1088_v40 }
  0x64   :  { %v554_v46 = vrot.slane %v503_v34, 7  ;;  %v555_v60 = vrot.slane %v510_v59, 6  ;;  %v531_v47 = vadd.f32 %v530_v42, %v529_v28  ;;  %v556_v49 = vrot.slane %v517_v41, 5 }
  0x65   :  { %v538_v48 = vadd.f32 %v537_v21, %v536_v57  ;;  %v544_v62 = vrot.slane %v543_v50, 1  ;;  %v479_v63 = vsel %vm478_vm7, %v1097_v8, %v1100_v9  ;;  %v557_v44 = vrot.slane %v524_v6, 4 }
  0x66   :  { %v561_v13 = vsel %vm466_vm1, %v496_v39, %v554_v46  ;;  %v558_v0 = vrot.slane %v531_v47, 3  ;;  %v562_v45 = vsel %vm468_vm2, %v555_v60, %v556_v49  ;;  %v481_v24 = vadd.f32 %v479_v63, %v248_v43 }
  0x67   :  { %v545_v14 = vadd.f32 %v544_v62, %v543_v50  ;;  %v559_v15 = vrot.slane %v538_v48, 2  ;;  %v563_v23 = vsel %vm470_vm3, %v561_v13, %v562_v45 }
  0x68   :  { %v564_v61 = vsel %vm472_vm4, %v557_v44, %v558_v0 }
  0x69   :  { %v560_v5 = vrot.slane %v545_v14, 1 }
  0x6b   :  { %v565_v40 = vsel %vm474_vm5, %v559_v15, %v560_v5 }
  0x6c   :  { %v566_v29 = vsel %vm476_vm6, %v564_v61, %v565_v40 }
  0x6d   :  { %v567_v8 = vsel %vm478_vm7, %v563_v23, %v566_v29 }
  0x6e   :  { %v569_v9 = vadd.f32 %v567_v8, %v481_v24 }
  0x70   :  { %v571_v7 = vperm.slane %v569_v9, 0  ;;  %v572_v54 = vperm.slane %v569_v9, 1  ;;  %v573_v52 = vperm.slane %v569_v9, 2  ;;  %v574_v55 = vperm.slane %v569_v9, 3 }
  0x71   :  { %v575_v11 = vperm.slane %v569_v9, 4  ;;  %v576_v19 = vperm.slane %v569_v9, 5  ;;  %v577_v56 = vperm.slane %v569_v9, 6  ;;  %v578_v3 = vperm.slane %v569_v9, 7 }
  0x72   :  { %v587_v12 = vsel %vm466_vm1, %v571_v7, 0.0  ;;  %v588_v2 = vsel %vm466_vm1, %v572_v54, 0.0  ;;  %v590_v17 = vsel %vm466_vm1, %v573_v52, 0.0  ;;  %v592_v25 = vsel %vm466_vm1, %v574_v55, 0.0 }
  0x73   :  { %v589_v18 = vadd.f32 %v588_v2, %v587_v12  ;;  %v594_v31 = vsel %vm466_vm1, %v575_v11, 0.0  ;;  %v596_v4 = vsel %vm466_vm1, %v576_v19, 0.0  ;;  %v598_v37 = vsel %vm466_vm1, %v577_v56, 0.0 }
  0x74   :  { %v600_v36 = vsel %vm466_vm1, %v578_v3, 0.0 }
  0x75   :  { %v591_v30 = vadd.f32 %v590_v17, %v589_v18 }
  0x77   :  { %v593_v20 = vadd.f32 %v592_v25, %v591_v30 }
  0x79   :  { %v595_v32 = vadd.f32 %v594_v31, %v593_v20 }
  0x7b   :  { %v597_v53 = vadd.f32 %v596_v4, %v595_v32 }
  0x7d   :  { %v599_v51 = vadd.f32 %v598_v37, %v597_v53 }
  0x7f   :  { %v601_v58 = vadd.f32 %v600_v36, %v599_v51 }
  0x81   :  { %602 = vadd.xlane.f32.xlu0 %v601_v58 }
  0xf4   :  { %v603_v1 = vpop.xlane.xlu0 %602 }
  0xf5   :  { %v604_v10 = vrot.slane %v603_v1, 4 }
  0xf7   :  { %v605_v16 = vadd.f32 %v604_v10, %v603_v1 }
  0xf9   :  { %v606_v22 = vrot.slane %v605_v16, 2 }
  0xfb   :  { %v607_v26 = vadd.f32 %v606_v22, %v605_v16 }
  0xfd   :  { %v608_v27 = vrot.slane %v607_v26, 1 }
  0xff   :  { %v609_v38 = vadd.f32 %v608_v27, %v607_v26 }
 0x101   :  { %639 = vpush %v609_v38 }
 0x132   :  { %s640_s11 = spop %639 }
 0x133   :  { %s611_s12 = smul.f32 0.5, %s640_s11 }
 0x135   :  { %613 = sst [smem:[#allocation2]] %s611_s12 }
 0x136   :  { %622 = dma.smem_to_hbm %s656_s13, 16, %s620_s10, [#allocation3]  }
 0x137   :  { %654 = dma.done.wait [#allocation3], 16  }
 0x138   :  { %655 = vsyncadd [#allocation3], 4294967280 }
 0x139   :  { %627 = sfence }
 0x13a   :  { %628 = vsyncpa [#allocation3], 1 }

</bundles_post_ra>
